<compile_context>
chip_gen: v7x
topology: tpu7x:2x2x1
jax: 0.10.0
libtpu: 0.0.40
codegen_flags: <defaults>
</compile_context>

<pallas_src>
import jax
import jax.numpy as jnp
from jax.experimental import pallas as pl
from jax.experimental.pallas import tpu as pltpu

LN_EPS = 1e-12   # BertLayerNorm default eps
LANE = 128       # TPU lane width


def _round_up(n, m):
    return ((n + m - 1) // m) * m


def _pad_axis(x, axis, target):
    pad = target - x.shape[axis]
    if pad == 0:
        return x
    widths = [(0, 0)] * x.ndim
    widths[axis] = (0, pad)
    return jnp.pad(x, widths)


def _erf(z):
    # Abramowitz & Stegun 7.1.26 (max abs error ~1.5e-7) -- only exp/mul/add/select,
    # so it lowers cleanly in Mosaic and matches exact erf to f32 precision.
    a1, a2, a3, a4, a5 = (0.254829592, -0.284496736, 1.421413741,
                          -1.453152027, 1.061405429)
    p = 0.3275911
    sign = jnp.where(z >= 0.0, 1.0, -1.0)
    az = jnp.abs(z)
    t = 1.0 / (1.0 + p * az)
    poly = ((((a5 * t + a4) * t + a3) * t + a2) * t + a1) * t
    return sign * (1.0 - poly * jnp.exp(-az * az))


def _gelu_exact(x):
    # torch.nn.GELU default (exact, erf-based).
    return 0.5 * x * (1.0 + _erf(x * 0.7071067811865476))


def _make_kernel(h_real, h_pad):
    """Build the fused kernel. h_real = true hidden size (for LN stats)."""
    mask_hidden = (h_real != h_pad)
    inv_h = 1.0 / float(h_real)

    def kernel(
        h_ref,        # (TM, I_p)   hidden_states tile (intermediate features)
        inp_ref,      # (TM, H_p)   input_tensor tile (residual)
        wd_ref,       # (I_p, H_p)  dense weight (in x out)
        bd_ref,       # (1, H_p)    dense bias
        wdn_ref,      # (H_p, A_p)  adapter down-proj weight
        bdn_ref,      # (1, A_p)    adapter down-proj bias
        wup_ref,      # (A_p, H_p)  adapter up-proj weight
        bup_ref,      # (1, H_p)    adapter up-proj bias
        gamma_ref,    # (1, H_p)    LayerNorm weight (zero in padded lanes)
        beta_ref,     # (1, H_p)    LayerNorm bias   (zero in padded lanes)
        out_ref,      # (TM, H_p)
    ):
        # Hoisted single reads of the small (1, *) vectors.
        bd = bd_ref[...].astype(jnp.float32)
        bdn = bdn_ref[...].astype(jnp.float32)
        bup = bup_ref[...].astype(jnp.float32)
        gamma = gamma_ref[...].astype(jnp.float32)
        beta = beta_ref[...].astype(jnp.float32)

        # Dense projection (intermediate -> hidden): native-dtype operands on
        # the MXU, f32 accumulation.
        x = jnp.dot(h_ref[...], wd_ref[...],
                    preferred_element_type=jnp.float32) + bd

        # Dropout in eval mode is identity.
        # TODO(synk): training-mode dropout would need pltpu.prng_seed/prng_random_bits.

        # Bottleneck adapter: down -> exact GELU -> up -> residual.
        d = jnp.dot(x.astype(wdn_ref.dtype), wdn_ref[...],
                    preferred_element_type=jnp.float32) + bdn
        d = _gelu_exact(d)
        u = jnp.dot(d.astype(wup_ref.dtype), wup_ref[...],
                    preferred_element_type=jnp.float32) + bup

        # Residual adds, then LayerNorm over the (real) hidden axis.
        y = x + u + inp_ref[...].astype(jnp.float32)

        if mask_hidden:
            lane = jax.lax.broadcasted_iota(jnp.int32, y.shape, 1)
            valid = lane < h_real
            y = jnp.where(valid, y, 0.0)
            mean = jnp.sum(y, axis=-1, keepdims=True) * inv_h
            cent = jnp.where(valid, y - mean, 0.0)
            var = jnp.sum(cent * cent, axis=-1, keepdims=True) * inv_h
        else:
            mean = jnp.mean(y, axis=-1, keepdims=True)
            cent = y - mean
            var = jnp.mean(cent * cent, axis=-1, keepdims=True)

        yn = cent * jax.lax.rsqrt(var + LN_EPS)
        out_ref[...] = (yn * gamma + beta).astype(out_ref.dtype)

    return kernel


def adapter_bert_output(hidden_states, input_tensor, params, *,
                        tm=256, vmem_limit_bytes=48 * 1024 * 1024):
    """hidden_states: (B, S, I), input_tensor: (B, S, H) -> (B, S, H).

    Weights are fed to the MXU in their native dtype (pass bf16 params for bf16
    models).  tm: row tile; 128-512 for production shapes (v6e can use 512 with a
    larger vmem_limit_bytes; v7x/v5e prefer <=256).  Rows and feature axes are
    zero-padded so arbitrary shapes work.
    """
    B, S, I = hidden_states.shape
    H = input_tensor.shape[-1]
    A = params["w_down"].shape[-1]
    M = B * S

    # Lane-dense feature padding.
    I_p = _round_up(I, LANE)
    H_p = _round_up(H, LANE)
    A_p = _round_up(A, LANE)

    # Row tile: clamp to the (8-aligned) row count for small inputs, otherwise tm.
    tm_eff = min(tm, _round_up(M, 8))
    M_p = _round_up(M, tm_eff)
    grid = (M_p // tm_eff,)

    h2 = _pad_axis(_pad_axis(hidden_states.reshape(M, I), 1, I_p), 0, M_p)
    in2 = _pad_axis(_pad_axis(input_tensor.reshape(M, H), 1, H_p), 0, M_p)

    wd = _pad_axis(_pad_axis(params["w_dense"], 0, I_p), 1, H_p)
    bd = _pad_axis(params["b_dense"], 1, H_p)
    wdn = _pad_axis(_pad_axis(params["w_down"], 0, H_p), 1, A_p)
    bdn = _pad_axis(params["b_down"], 1, A_p)
    wup = _pad_axis(_pad_axis(params["w_up"], 0, A_p), 1, H_p)
    bup = _pad_axis(params["b_up"], 1, H_p)
    gamma = _pad_axis(params["ln_gamma"], 1, H_p)
    beta = _pad_axis(params["ln_beta"], 1, H_p)

    row_I = pl.BlockSpec((tm_eff, I_p), lambda i: (i, 0))
    row_H = pl.BlockSpec((tm_eff, H_p), lambda i: (i, 0))
    full = lambda shape: pl.BlockSpec(shape, lambda i: (0, 0))

    out2 = pl.pallas_call(
        _make_kernel(H, H_p),
        out_shape=jax.ShapeDtypeStruct((M_p, H_p), hidden_states.dtype),
        grid_spec=pltpu.PrefetchScalarGridSpec(
            num_scalar_prefetch=0,
            grid=grid,
            in_specs=[
                row_I,                 # hidden_states tile
                row_H,                 # input_tensor tile
                full((I_p, H_p)),      # dense weight (resident)
                full((1, H_p)),        # dense bias
                full((H_p, A_p)),      # adapter down weight
                full((1, A_p)),        # adapter down bias
                full((A_p, H_p)),      # adapter up weight
                full((1, H_p)),        # adapter up bias
                full((1, H_p)),        # LN gamma
                full((1, H_p)),        # LN beta
            ],
            out_specs=row_H,
        ),
        compiler_params=pltpu.CompilerParams(
            dimension_semantics=("parallel",),   # row tiles split across TCs on v7x
            vmem_limit_bytes=vmem_limit_bytes,
        ),
    )(h2, in2, wd, bd, wdn, bdn, wup, bup, gamma, beta)

    return out2[:M, :H].reshape(B, S, H)


def reference(hidden_states, input_tensor, params):
    """Pure-JAX reference (exact GELU, matching torch.nn.GELU default)."""
    x = jnp.einsum("bsi,ih->bsh", hidden_states, params["w_dense"]) + params["b_dense"][0]
    d = jax.nn.gelu(
        jnp.einsum("bsh,ha->bsa", x, params["w_down"]) + params["b_down"][0],
        approximate=False)
    u = jnp.einsum("bsa,ah->bsh", d, params["w_up"]) + params["b_up"][0]
    x = x + u
    y = x + input_tensor
    mean = jnp.mean(y, axis=-1, keepdims=True)
    var = jnp.mean((y - mean) ** 2, axis=-1, keepdims=True)
    return (y - mean) * jax.lax.rsqrt(var + LN_EPS) * params["ln_gamma"][0] + params["ln_beta"][0]


if __name__ == "__main__":
    B, S = 2, 8
    HIDDEN = 32          # hidden_size
    INTER = 64           # intermediate_size (input to dense)
    ADAPT = 16           # adapter bottleneck size

    key = jax.random.PRNGKey(0)
    ks = jax.random.split(key, 8)

    params = {
        "w_dense": 0.05 * jax.random.normal(ks[0], (INTER, HIDDEN), jnp.float32),
        "b_dense": 0.01 * jax.random.normal(ks[1], (1, HIDDEN), jnp.float32),
        "w_down":  0.05 * jax.random.normal(ks[2], (HIDDEN, ADAPT), jnp.float32),
        "b_down":  0.01 * jax.random.normal(ks[3], (1, ADAPT), jnp.float32),
        "w_up":    0.05 * jax.random.normal(ks[4], (ADAPT, HIDDEN), jnp.float32),
        "b_up":    0.01 * jax.random.normal(ks[5], (1, HIDDEN), jnp.float32),
        "ln_gamma": jnp.ones((1, HIDDEN), jnp.float32),
        "ln_beta":  jnp.zeros((1, HIDDEN), jnp.float32),
    }

    hidden_states = jax.random.normal(ks[6], (B, S, INTER), jnp.float32)
    input_tensor = jax.random.normal(ks[7], (B, S, HIDDEN), jnp.float32)

    out = adapter_bert_output(hidden_states, input_tensor, params)
    out = jax.block_until_ready(out)

    ref = reference(hidden_states, input_tensor, params)
    assert out.shape == (B, S, HIDDEN)
    assert jnp.allclose(out, ref, atol=1e-4, rtol=1e-4), "mismatch vs reference"

    print("KERNEL_OK")
</pallas_src>

<mosaic_0001>
module attributes {stable_mosaic.version = 11 : i64} {
  func.func @kernel(%arg0: i32, %arg1: memref<16x128xf32, #tpu.memory_space<vmem>>, %arg2: memref<16x128xf32, #tpu.memory_space<vmem>>, %arg3: memref<128x128xf32, #tpu.memory_space<vmem>>, %arg4: memref<1x128xf32, #tpu.memory_space<vmem>>, %arg5: memref<128x128xf32, #tpu.memory_space<vmem>>, %arg6: memref<1x128xf32, #tpu.memory_space<vmem>>, %arg7: memref<128x128xf32, #tpu.memory_space<vmem>>, %arg8: memref<1x128xf32, #tpu.memory_space<vmem>>, %arg9: memref<1x128xf32, #tpu.memory_space<vmem>>, %arg10: memref<1x128xf32, #tpu.memory_space<vmem>>, %arg11: memref<16x128xf32, #tpu.memory_space<vmem>>) attributes {dimension_semantics = [#tpu.dimension_semantics<parallel>], iteration_bounds = array<i64: 1>, scalar_prefetch = 0 : i64, scratch_operands = 0 : i64, tpu.core_type = #tpu.core_type<tc>, window_params = [{transform_indices = @transform_0, window_bounds = array<i64: 16, 128>}, {transform_indices = @transform_1, window_bounds = array<i64: 16, 128>}, {pipeline_mode = #tpu.pipeline_mode<synchronous>, transform_indices = @transform_2, window_bounds = array<i64: 128, 128>}, {pipeline_mode = #tpu.pipeline_mode<synchronous>, transform_indices = @transform_3, window_bounds = array<i64: 1, 128>}, {pipeline_mode = #tpu.pipeline_mode<synchronous>, transform_indices = @transform_4, window_bounds = array<i64: 128, 128>}, {pipeline_mode = #tpu.pipeline_mode<synchronous>, transform_indices = @transform_5, window_bounds = array<i64: 1, 128>}, {pipeline_mode = #tpu.pipeline_mode<synchronous>, transform_indices = @transform_6, window_bounds = array<i64: 128, 128>}, {pipeline_mode = #tpu.pipeline_mode<synchronous>, transform_indices = @transform_7, window_bounds = array<i64: 1, 128>}, {pipeline_mode = #tpu.pipeline_mode<synchronous>, transform_indices = @transform_8, window_bounds = array<i64: 1, 128>}, {pipeline_mode = #tpu.pipeline_mode<synchronous>, transform_indices = @transform_9, window_bounds = array<i64: 1, 128>}, {transform_indices = @transform_10, window_bounds = array<i64: 16, 128>}]} {
    %c0 = arith.constant 0 : index
    %c0_0 = arith.constant 0 : index
    %0 = vector.load %arg4[%c0, %c0_0] : memref<1x128xf32, #tpu.memory_space<vmem>>, vector<1x128xf32>
    %c0_1 = arith.constant 0 : index
    %c0_2 = arith.constant 0 : index
    %1 = vector.load %arg6[%c0_1, %c0_2] : memref<1x128xf32, #tpu.memory_space<vmem>>, vector<1x128xf32>
    %c0_3 = arith.constant 0 : index
    %c0_4 = arith.constant 0 : index
    %2 = vector.load %arg8[%c0_3, %c0_4] : memref<1x128xf32, #tpu.memory_space<vmem>>, vector<1x128xf32>
    %c0_5 = arith.constant 0 : index
    %c0_6 = arith.constant 0 : index
    %3 = vector.load %arg9[%c0_5, %c0_6] : memref<1x128xf32, #tpu.memory_space<vmem>>, vector<1x128xf32>
    %c0_7 = arith.constant 0 : index
    %c0_8 = arith.constant 0 : index
    %4 = vector.load %arg10[%c0_7, %c0_8] : memref<1x128xf32, #tpu.memory_space<vmem>>, vector<1x128xf32>
    %c0_9 = arith.constant 0 : index
    %c0_10 = arith.constant 0 : index
    %5 = vector.load %arg1[%c0_9, %c0_10] : memref<16x128xf32, #tpu.memory_space<vmem>>, vector<16x128xf32>
    %c0_11 = arith.constant 0 : index
    %c0_12 = arith.constant 0 : index
    %6 = vector.load %arg3[%c0_11, %c0_12] : memref<128x128xf32, #tpu.memory_space<vmem>>, vector<128x128xf32>
    %cst = arith.constant dense<0.000000e+00> : vector<16x128xf32>
    %7 = tpu.matmul %5, %6, %cst {dimension_numbers = #tpu.dot_dimension_numbers<[1], [0], [0], [1], [0, 0, 1, 1], [], []>} : vector<16x128xf32>, vector<128x128xf32>, vector<16x128xf32> -> vector<16x128xf32>
    %8 = vector.broadcast %0 : vector<1x128xf32> to vector<16x128xf32>
    %9 = arith.addf %7, %8 : vector<16x128xf32>
    %c0_13 = arith.constant 0 : index
    %c0_14 = arith.constant 0 : index
    %10 = vector.load %arg5[%c0_13, %c0_14] : memref<128x128xf32, #tpu.memory_space<vmem>>, vector<128x128xf32>
    %cst_15 = arith.constant dense<0.000000e+00> : vector<16x128xf32>
    %11 = tpu.matmul %9, %10, %cst_15 {dimension_numbers = #tpu.dot_dimension_numbers<[1], [0], [0], [1], [0, 0, 1, 1], [], []>} : vector<16x128xf32>, vector<128x128xf32>, vector<16x128xf32> -> vector<16x128xf32>
    %12 = vector.broadcast %1 : vector<1x128xf32> to vector<16x128xf32>
    %13 = arith.addf %11, %12 : vector<16x128xf32>
    %cst_16 = arith.constant 5.000000e-01 : f32
    %14 = vector.broadcast %cst_16 : f32 to vector<16x128xf32>
    %15 = arith.mulf %14, %13 : vector<16x128xf32>
    %cst_17 = arith.constant 0.707106769 : f32
    %16 = vector.broadcast %cst_17 : f32 to vector<16x128xf32>
    %17 = arith.mulf %13, %16 : vector<16x128xf32>
    %cst_18 = arith.constant 0.000000e+00 : f32
    %18 = vector.broadcast %cst_18 : f32 to vector<16x128xf32>
    %19 = arith.cmpf oge, %17, %18 : vector<16x128xf32>
    %cst_19 = arith.constant 1.000000e+00 : f32
    %cst_20 = arith.constant -1.000000e+00 : f32
    %20 = vector.broadcast %cst_19 : f32 to vector<16x128xf32>
    %21 = vector.broadcast %cst_20 : f32 to vector<16x128xf32>
    %22 = arith.select %19, %20, %21 : vector<16x128xi1>, vector<16x128xf32>
    %23 = math.absf %17 : vector<16x128xf32>
    %cst_21 = arith.constant 0.327591091 : f32
    %24 = vector.broadcast %cst_21 : f32 to vector<16x128xf32>
    %25 = arith.mulf %24, %23 : vector<16x128xf32>
    %cst_22 = arith.constant 1.000000e+00 : f32
    %26 = vector.broadcast %cst_22 : f32 to vector<16x128xf32>
    %27 = arith.addf %26, %25 : vector<16x128xf32>
    %cst_23 = arith.constant 1.000000e+00 : f32
    %28 = vector.broadcast %cst_23 : f32 to vector<16x128xf32>
    %29 = arith.divf %28, %27 : vector<16x128xf32>
    %cst_24 = arith.constant 1.06140542 : f32
    %30 = vector.broadcast %cst_24 : f32 to vector<16x128xf32>
    %31 = arith.mulf %30, %29 : vector<16x128xf32>
    %cst_25 = arith.constant -1.45315206 : f32
    %32 = vector.broadcast %cst_25 : f32 to vector<16x128xf32>
    %33 = arith.addf %31, %32 : vector<16x128xf32>
    %34 = arith.mulf %33, %29 : vector<16x128xf32>
    %cst_26 = arith.constant 1.42141378 : f32
    %35 = vector.broadcast %cst_26 : f32 to vector<16x128xf32>
    %36 = arith.addf %34, %35 : vector<16x128xf32>
    %37 = arith.mulf %36, %29 : vector<16x128xf32>
    %cst_27 = arith.constant -0.284496725 : f32
    %38 = vector.broadcast %cst_27 : f32 to vector<16x128xf32>
    %39 = arith.addf %37, %38 : vector<16x128xf32>
    %40 = arith.mulf %39, %29 : vector<16x128xf32>
    %cst_28 = arith.constant 0.254829586 : f32
    %41 = vector.broadcast %cst_28 : f32 to vector<16x128xf32>
    %42 = arith.addf %40, %41 : vector<16x128xf32>
    %43 = arith.mulf %42, %29 : vector<16x128xf32>
    %cst_29 = arith.constant 0.000000e+00 : f32
    %44 = vector.broadcast %cst_29 : f32 to vector<16x128xf32>
    %45 = arith.subf %44, %23 : vector<16x128xf32>
    %46 = arith.mulf %45, %23 : vector<16x128xf32>
    %47 = math.exp %46 : vector<16x128xf32>
    %48 = arith.mulf %43, %47 : vector<16x128xf32>
    %cst_30 = arith.constant 1.000000e+00 : f32
    %49 = vector.broadcast %cst_30 : f32 to vector<16x128xf32>
    %50 = arith.subf %49, %48 : vector<16x128xf32>
    %51 = arith.mulf %22, %50 : vector<16x128xf32>
    %cst_31 = arith.constant 1.000000e+00 : f32
    %52 = vector.broadcast %cst_31 : f32 to vector<16x128xf32>
    %53 = arith.addf %52, %51 : vector<16x128xf32>
    %54 = arith.mulf %15, %53 : vector<16x128xf32>
    %c0_32 = arith.constant 0 : index
    %c0_33 = arith.constant 0 : index
    %55 = vector.load %arg7[%c0_32, %c0_33] : memref<128x128xf32, #tpu.memory_space<vmem>>, vector<128x128xf32>
    %cst_34 = arith.constant dense<0.000000e+00> : vector<16x128xf32>
    %56 = tpu.matmul %54, %55, %cst_34 {dimension_numbers = #tpu.dot_dimension_numbers<[1], [0], [0], [1], [0, 0, 1, 1], [], []>} : vector<16x128xf32>, vector<128x128xf32>, vector<16x128xf32> -> vector<16x128xf32>
    %57 = vector.broadcast %2 : vector<1x128xf32> to vector<16x128xf32>
    %58 = arith.addf %56, %57 : vector<16x128xf32>
    %59 = arith.addf %9, %58 : vector<16x128xf32>
    %c0_35 = arith.constant 0 : index
    %c0_36 = arith.constant 0 : index
    %60 = vector.load %arg2[%c0_35, %c0_36] : memref<16x128xf32, #tpu.memory_space<vmem>>, vector<16x128xf32>
    %61 = arith.addf %59, %60 : vector<16x128xf32>
    %62 = tpu.iota {dimensions = array<i32: 1>} : vector<16x128xi32>
    %c32_i32 = arith.constant 32 : i32
    %63 = vector.broadcast %c32_i32 : i32 to vector<16x128xi32>
    %64 = arith.cmpi slt, %62, %63 : vector<16x128xi32>
    %cst_37 = arith.constant 0.000000e+00 : f32
    %65 = vector.broadcast %cst_37 : f32 to vector<16x128xf32>
    %66 = arith.select %64, %61, %65 : vector<16x128xi1>, vector<16x128xf32>
    %cst_38 = arith.constant dense<0.000000e+00> : vector<16xf32>
    %67 = vector.multi_reduction <add>, %66, %cst_38 [1] : vector<16x128xf32> to vector<16xf32>
    %68 = vector.shape_cast %67 : vector<16xf32> to vector<16x1xf32>
    %cst_39 = arith.constant 3.125000e-02 : f32
    %69 = vector.broadcast %cst_39 : f32 to vector<16x1xf32>
    %70 = arith.mulf %68, %69 : vector<16x1xf32>
    %71 = vector.broadcast %70 : vector<16x1xf32> to vector<16x128xf32>
    %72 = arith.subf %66, %71 : vector<16x128xf32>
    %cst_40 = arith.constant 0.000000e+00 : f32
    %73 = vector.broadcast %cst_40 : f32 to vector<16x128xf32>
    %74 = arith.select %64, %72, %73 : vector<16x128xi1>, vector<16x128xf32>
    %75 = arith.mulf %74, %74 : vector<16x128xf32>
    %cst_41 = arith.constant dense<0.000000e+00> : vector<16xf32>
    %76 = vector.multi_reduction <add>, %75, %cst_41 [1] : vector<16x128xf32> to vector<16xf32>
    %77 = vector.shape_cast %76 : vector<16xf32> to vector<16x1xf32>
    %cst_42 = arith.constant 3.125000e-02 : f32
    %78 = vector.broadcast %cst_42 : f32 to vector<16x1xf32>
    %79 = arith.mulf %77, %78 : vector<16x1xf32>
    %cst_43 = arith.constant 9.99999996E-13 : f32
    %80 = vector.broadcast %cst_43 : f32 to vector<16x1xf32>
    %81 = arith.addf %79, %80 : vector<16x1xf32>
    %82 = math.rsqrt %81 : vector<16x1xf32>
    %83 = vector.broadcast %82 : vector<16x1xf32> to vector<16x128xf32>
    %84 = arith.mulf %74, %83 : vector<16x128xf32>
    %85 = vector.broadcast %3 : vector<1x128xf32> to vector<16x128xf32>
    %86 = arith.mulf %84, %85 : vector<16x128xf32>
    %87 = vector.broadcast %4 : vector<1x128xf32> to vector<16x128xf32>
    %88 = arith.addf %86, %87 : vector<16x128xf32>
    %c0_44 = arith.constant 0 : index
    %c0_45 = arith.constant 0 : index
    %89 = vector.load %arg11[%c0_44, %c0_45] : memref<16x128xf32, #tpu.memory_space<vmem>>, vector<16x128xf32>
    tpu.vector_store %arg11[%c0_44, %c0_45], %88 {strides = array<i32>} : memref<16x128xf32, #tpu.memory_space<vmem>>, vector<16x128xf32>,
    return
  }
  func.func @transform_0(%arg0: i32) -> (i32, i32) {
    %c0_i32 = arith.constant 0 : i32
    %c0_i32_0 = arith.constant 0 : i32
    return %arg0, %c0_i32 : i32, i32
  }
  func.func @transform_1(%arg0: i32) -> (i32, i32) {
    %c0_i32 = arith.constant 0 : i32
    %c0_i32_0 = arith.constant 0 : i32
    return %arg0, %c0_i32 : i32, i32
  }
  func.func @transform_2(%arg0: i32) -> (i32, i32) {
    %c0_i32 = arith.constant 0 : i32
    %c0_i32_0 = arith.constant 0 : i32
    %c0_i32_1 = arith.constant 0 : i32
    return %c0_i32, %c0_i32_0 : i32, i32
  }
  func.func @transform_3(%arg0: i32) -> (i32, i32) {
    %c0_i32 = arith.constant 0 : i32
    %c0_i32_0 = arith.constant 0 : i32
    %c0_i32_1 = arith.constant 0 : i32
    return %c0_i32, %c0_i32_0 : i32, i32
  }
  func.func @transform_4(%arg0: i32) -> (i32, i32) {
    %c0_i32 = arith.constant 0 : i32
    %c0_i32_0 = arith.constant 0 : i32
    %c0_i32_1 = arith.constant 0 : i32
    return %c0_i32, %c0_i32_0 : i32, i32
  }
  func.func @transform_5(%arg0: i32) -> (i32, i32) {
    %c0_i32 = arith.constant 0 : i32
    %c0_i32_0 = arith.constant 0 : i32
    %c0_i32_1 = arith.constant 0 : i32
    return %c0_i32, %c0_i32_0 : i32, i32
  }
  func.func @transform_6(%arg0: i32) -> (i32, i32) {
    %c0_i32 = arith.constant 0 : i32
    %c0_i32_0 = arith.constant 0 : i32
    %c0_i32_1 = arith.constant 0 : i32
    return %c0_i32, %c0_i32_0 : i32, i32
  }
  func.func @transform_7(%arg0: i32) -> (i32, i32) {
    %c0_i32 = arith.constant 0 : i32
    %c0_i32_0 = arith.constant 0 : i32
    %c0_i32_1 = arith.constant 0 : i32
    return %c0_i32, %c0_i32_0 : i32, i32
  }
  func.func @transform_8(%arg0: i32) -> (i32, i32) {
    %c0_i32 = arith.constant 0 : i32
    %c0_i32_0 = arith.constant 0 : i32
    %c0_i32_1 = arith.constant 0 : i32
    return %c0_i32, %c0_i32_0 : i32, i32
  }
  func.func @transform_9(%arg0: i32) -> (i32, i32) {
    %c0_i32 = arith.constant 0 : i32
    %c0_i32_0 = arith.constant 0 : i32
    %c0_i32_1 = arith.constant 0 : i32
    return %c0_i32, %c0_i32_0 : i32, i32
  }
  func.func @transform_10(%arg0: i32) -> (i32, i32) {
    %c0_i32 = arith.constant 0 : i32
    %c0_i32_0 = arith.constant 0 : i32
    return %arg0, %c0_i32 : i32, i32
  }
}

</mosaic_0001>

<bundles_post_ra>
// kernel: tpu_custom_call.1
= control target key start
LH: loop header
LB: loop body
LE: loop exit
PB: predicated region body
PF: predicated region fallthrough
CT: control target
= control target key end

     0   :  { %15 = vsyncpa [#allocation3], 0  ;;  %s1144_s0 = inlined_call_operand.hbm [shape: f32[16,128], index: 0, kind: input, shape index: {}]   ;;  %s1145_s1 = inlined_call_operand.hbm [shape: f32[16,128], index: 1, kind: input, shape index: {}]   ;;  %s1146_s2 = inlined_call_operand.hbm [shape: f32[128,128], index: 2, kind: input, shape index: {}]   ;;  %s1147_s3 = inlined_call_operand.vmem [shape: f32[1,128], index: 3, kind: input, shape index: {}]   ;;  %s1148_s4 = inlined_call_operand.hbm [shape: f32[128,128], index: 4, kind: input, shape index: {}]   ;;  %s1149_s5 = inlined_call_operand.vmem [shape: f32[1,128], index: 5, kind: input, shape index: {}]   ;;  %s1150_s6 = inlined_call_operand.hbm [shape: f32[128,128], index: 6, kind: input, shape index: {}]   ;;  %s1151_s7 = inlined_call_operand.vmem [shape: f32[1,128], index: 7, kind: input, shape index: {}]   ;;  %s1152_s8 = inlined_call_operand.vmem [shape: f32[1,128], index: 8, kind: input, shape index: {}]   ;;  %s1153_s9 = inlined_call_operand.vmem [shape: f32[1,128], index: 9, kind: input, shape index: {}]   ;;  %s1154_s10 = inlined_call_operand.hbm [shape: f32[16,128], index: 10, kind: output, shape index: {}]  }
   0x1   :  { %16 = vsyncpa [#allocation6], 0 }
   0x2   :  { %17 = vsyncpa [#allocation9], 0 }
   0x3   :  { %18 = vsyncpa [#allocation4], 0  ;;  %s949_s13 = smov [#allocation5]   ;;  %s950_s15 = smov [#allocation8]  }
   0x4   :  { %s36_s14 = sshll.u32 %s949_s13, 4  ;;  %s62_s16 = sshll.u32 %s950_s15, 4  ;;  %s37_s14 = int_to_ptr.vmem [resolvable:$true] %s36_s14  ;;  %s1013_s16 = int_to_ptr.vmem [resolvable:$true] %s62_s16 }
   0x5   :  { %s809_s19 = scalar_lea.hbm %s1145_s1, 256 }
   0x6   :  { %p810_p0 = scmp.ne.s32.totalorder %s1145_s1, %s809_s19  ;;  %p813_p1 = scmp.lt.u32.totalorder %s809_s19, %s1145_s1 }
   0x8   :  { %p815_p2 = pnand %p813_p1, %p810_p0 }
   0xa   :  { %818 = shalt.err (!%p815_p2)
}
   0xb   :  { %s819_s24 = scalar_lea.vmem %s37_s14, 256  ;;  %p824_p4 = scmp.lt.s32.totalorder %s37_s14, %s37_s14 }
   0xc   :  { %p820_p3 = scmp.ne.s32.totalorder %s37_s14, %s819_s24  ;;  %p825_p5 = scmp.lt.s32.totalorder %s819_s24, %s819_s24 }
   0xe   :  { %p826_p6 = por %p825_p5, %p824_p4 }
  0x10   :  { %p827_p7 = pnand %p826_p6, %p820_p3 }
  0x12   :  { %830 = shalt.err (!%p827_p7)
}
  0x13   :  { %s951_s25 = smov 128   ;;  %s952_s26 = smov 8  }
  0x14   :  { %42 = dma.hbm_to_vmem [thread:$0]  %s1145_s1, 256, %s37_s14, [#allocation6], %s951_s25, %s951_s25, %s952_s26  }
  0x15   :  { %s831_s11 = scalar_lea.hbm %s1148_s4, 2048 }
  0x16   :  { %p832_p8 = scmp.ne.s32.totalorder %s1148_s4, %s831_s11  ;;  %p835_p9 = scmp.lt.u32.totalorder %s831_s11, %s1148_s4 }
  0x18   :  { %p837_p10 = pnand %p835_p9, %p832_p8 }
  0x1a   :  { %840 = shalt.err (!%p837_p10)
}
  0x1b   :  { %s841_s18 = scalar_lea.vmem %s1013_s16, 2048  ;;  %p846_p12 = scmp.lt.s32.totalorder %s1013_s16, %s1013_s16 }
  0x1c   :  { %p842_p11 = scmp.ne.s32.totalorder %s1013_s16, %s841_s18  ;;  %p847_p13 = scmp.lt.s32.totalorder %s841_s18, %s841_s18 }
  0x1e   :  { %p848_p0 = por %p847_p13, %p846_p12 }
  0x20   :  { %p849_p1 = pnand %p848_p0, %p842_p11 }
  0x22   :  { %852 = shalt.err (!%p849_p1)
}
  0x23   :  { %68 = dma.hbm_to_vmem [thread:$0]  %s1148_s4, 2048, %s1013_s16, [#allocation9], %s951_s25, %s951_s25, %s952_s26  }
  0x24   :  { %s953_s19 = smov [#allocation2]   ;;  %s954_s21 = smov [#allocation7]  }
  0x25   :  { %s24_s20 = sshll.u32 %s953_s19, 4  ;;  %s48_s22 = sshll.u32 %s954_s21, 4  ;;  %s25_s20 = int_to_ptr.vmem [resolvable:$true] %s24_s20  ;;  %s1050_s22 = int_to_ptr.vmem [resolvable:$true] %s48_s22 }
  0x26   :  { %s853_s27 = scalar_lea.hbm %s1144_s0, 256 }
  0x27   :  { %p854_p2 = scmp.ne.s32.totalorder %s1144_s0, %s853_s27  ;;  %p857_p3 = scmp.lt.u32.totalorder %s853_s27, %s1144_s0 }
  0x29   :  { %p859_p4 = pnand %p857_p3, %p854_p2 }
  0x2b   :  { %862 = shalt.err (!%p859_p4)
}
  0x2c   :  { %s863_s4 = scalar_lea.vmem %s25_s20, 256  ;;  %p868_p6 = scmp.lt.s32.totalorder %s25_s20, %s25_s20 }
  0x2d   :  { %p864_p5 = scmp.ne.s32.totalorder %s25_s20, %s863_s4  ;;  %p869_p7 = scmp.lt.s32.totalorder %s863_s4, %s863_s4 }
  0x2f   :  { %p870_p8 = por %p869_p7, %p868_p6 }
  0x31   :  { %p871_p9 = pnand %p870_p8, %p864_p5 }
  0x33   :  { %874 = shalt.err (!%p871_p9)
}
  0x34   :  { %30 = dma.hbm_to_vmem [thread:$0]  %s1144_s0, 256, %s25_s20, [#allocation3], %s951_s25, %s951_s25, %s952_s26  }
  0x35   :  { %s875_s17 = scalar_lea.hbm %s1146_s2, 2048 }
  0x36   :  { %p876_p10 = scmp.ne.s32.totalorder %s1146_s2, %s875_s17  ;;  %p879_p11 = scmp.lt.u32.totalorder %s875_s17, %s1146_s2 }
  0x38   :  { %p881_p12 = pnand %p879_p11, %p876_p10 }
  0x3a   :  { %884 = shalt.err (!%p881_p12)
}
  0x3b   :  { %s885_s21 = scalar_lea.vmem %s1050_s22, 2048  ;;  %p890_p0 = scmp.lt.s32.totalorder %s1050_s22, %s1050_s22 }
  0x3c   :  { %p886_p13 = scmp.ne.s32.totalorder %s1050_s22, %s885_s21  ;;  %p891_p1 = scmp.lt.s32.totalorder %s885_s21, %s885_s21 }
  0x3e   :  { %p892_p2 = por %p891_p1, %p890_p0 }
  0x40   :  { %p893_p3 = pnand %p892_p2, %p886_p13 }
  0x42   :  { %896 = shalt.err (!%p893_p3)
}
  0x43   :  { %54 = dma.hbm_to_vmem [thread:$0]  %s1146_s2, 2048, %s1050_s22, [#allocation6], %s951_s25, %s951_s25, %s952_s26  }
  0x44   :  { %s955_s23 = smov [#allocation10]   ;;  %s897_s29 = scalar_lea.hbm %s1150_s6, 2048 }
  0x45   :  { %s76_s24 = sshll.u32 %s955_s23, 4  ;;  %p898_p4 = scmp.ne.s32.totalorder %s1150_s6, %s897_s29  ;;  %s77_s24 = int_to_ptr.vmem [resolvable:$true] %s76_s24 }
  0x46   :  { %p901_p5 = scmp.lt.u32.totalorder %s897_s29, %s1150_s6 }
  0x48   :  { %p903_p6 = pnand %p901_p5, %p898_p4 }
  0x4a   :  { %906 = shalt.err (!%p903_p6)
}
  0x4b   :  { %s907_s12 = scalar_lea.vmem %s77_s24, 2048  ;;  %p912_p8 = scmp.lt.s32.totalorder %s77_s24, %s77_s24 }
  0x4c   :  { %p908_p7 = scmp.ne.s32.totalorder %s77_s24, %s907_s12  ;;  %p913_p9 = scmp.lt.s32.totalorder %s907_s12, %s907_s12 }
  0x4e   :  { %p914_p10 = por %p913_p9, %p912_p8 }
  0x50   :  { %p915_p11 = pnand %p914_p10, %p908_p7 }
  0x52   :  { %918 = shalt.err (!%p915_p11)
}
  0x53   :  { %82 = dma.hbm_to_vmem [thread:$0]  %s1150_s6, 2048, %s77_s24, [#allocation9], %s951_s25, %s951_s25, %s952_s26  }
  0x54   :  { %941 = dma.done.wait [#allocation3], 256  }
  0x55   :  { %942 = vsyncadd [#allocation3], 4294967040 }
  0x56   :  { %943 = dma.done.wait [#allocation6], 2304  }
  0x57   :  { %944 = vsyncadd [#allocation6], 4294964992 }
  0x58   :  { %945 = dma.done.wait [#allocation9], 4096  }
  0x59   :  { %946 = vsyncadd [#allocation9], 4294963200  ;;  %v111_v0 = vld [vmem:[#allocation7] sm:$0xff]  ;;  %v112_v1 = vld [vmem:[#allocation7 + $0x8] sm:$0xff]  ;;  %s957_s19 = smov [#allocation11]  }
  0x5a   :  { %v113_v2 = vld [vmem:[#allocation7 + $0x10] sm:$0xff]  ;;  %v692_v3 = vpack.c.bf16 %v112_v1, %v111_v0  ;;  %v114_v4 = vld [vmem:[#allocation7 + $0x18] sm:$0xff]  ;;  %v115_v6 = vld [vmem:[#allocation7 + $0x20] sm:$0xff]  ;;  %s514_s21 = sshll.u32 %s957_s19, 4  ;;  %s515_s21 = int_to_ptr.vmem [resolvable:$true] %s514_s21 }
  0x5b   :  { %v696_v5 = vpack.c.bf16 %v114_v4, %v113_v2  ;;  %v116_v7 = vld [vmem:[#allocation7 + $0x28] sm:$0xff]  ;;  %v117_v9 = vld [vmem:[#allocation7 + $0x30] sm:$0xff]  ;;  %v118_v10 = vld [vmem:[#allocation7 + $0x38] sm:$0xff]  ;;  %s919_s0 = scalar_lea.vmem %s515_s21, 256  ;;  %p924_p13 = scmp.lt.s32.totalorder %s515_s21, %s515_s21 }
  0x5c   :  { %693 = vmatprep.subr.bf16.mxu0 %v692_v3  ;;  %v700_v8 = vpack.c.bf16 %v116_v7, %v115_v6  ;;  %v109_v11 = vld [vmem:[#allocation2] sm:$0xff]  ;;  %v209_v13 = vld [vmem:[#allocation8 + $0x8] sm:$0xff]  ;;  %v210_v14 = vld [vmem:[#allocation8 + $0x10] sm:$0xff]  ;;  %v704_v20 = vpack.c.bf16 %v118_v10, %v117_v9  ;;  %p920_p12 = scmp.ne.s32.totalorder %s515_s21, %s919_s0  ;;  %p925_p0 = scmp.lt.s32.totalorder %s919_s0, %s919_s0 }
  0x5d   :  { %695 = vmatpush3.bf16.msra.mxu0 %v692_v3  ;;  %619 = vmatprep.mubr.f32.mxu0 %v109_v11  ;;  %v208_v12 = vld [vmem:[#allocation8] sm:$0xff]  ;;  %v211_v16 = vld [vmem:[#allocation8 + $0x18] sm:$0xff]  ;;  %v213_v19 = vld [vmem:[#allocation8 + $0x28] sm:$0xff] }
  0x5e   :  { %697 = vmatprep.subr.bf16.mxu0 %v696_v5  ;;  %v724_v15 = vpack.c.bf16 %v209_v13, %v208_v12  ;;  %v728_v17 = vpack.c.bf16 %v211_v16, %v210_v14  ;;  %v212_v18 = vld [vmem:[#allocation8 + $0x20] sm:$0xff]  ;;  %v120_v22 = vld [vmem:[#allocation7 + $0x48] sm:$0xff]  ;;  %v214_v24 = vld [vmem:[#allocation8 + $0x30] sm:$0xff]  ;;  %p926_p1 = por %p925_p0, %p924_p13 }
  0x5f   :  { %v119_v21 = vld [vmem:[#allocation7 + $0x40] sm:$0xff]  ;;  %v732_v23 = vpack.c.bf16 %v213_v19, %v212_v18  ;;  %v215_v25 = vld [vmem:[#allocation8 + $0x38] sm:$0xff]  ;;  %v121_v27 = vld [vmem:[#allocation7 + $0x50] sm:$0xff] }
  0x60   :  { %725 = vmatprep.subr.bf16.mxu1 %v724_v15  ;;  %v708_v26 = vpack.c.bf16 %v120_v22, %v119_v21  ;;  %v122_v28 = vld [vmem:[#allocation7 + $0x58] sm:$0xff]  ;;  %v736_v29 = vpack.c.bf16 %v215_v25, %v214_v24  ;;  %v216_v30 = vld [vmem:[#allocation8 + $0x40] sm:$0xff]  ;;  %v217_v31 = vld [vmem:[#allocation8 + $0x48] sm:$0xff]  ;;  %p927_p2 = pnand %p926_p1, %p920_p12 }
  0x61   :  { %699 = vmatpush3.bf16.msra.mxu0 %v696_v5  ;;  %727 = vmatpush3.bf16.msra.mxu1 %v724_v15  ;;  %v712_v32 = vpack.c.bf16 %v122_v28, %v121_v27  ;;  %v123_v33 = vld [vmem:[#allocation7 + $0x60] sm:$0xff]  ;;  %v124_v34 = vld [vmem:[#allocation7 + $0x68] sm:$0xff]  ;;  %v740_v35 = vpack.c.bf16 %v217_v31, %v216_v30  ;;  %v218_v36 = vld [vmem:[#allocation8 + $0x50] sm:$0xff] }
  0x62   :  { %701 = vmatprep.subr.bf16.mxu0 %v700_v8  ;;  %729 = vmatprep.subr.bf16.mxu1 %v728_v17  ;;  %v219_v37 = vld [vmem:[#allocation8 + $0x58] sm:$0xff]  ;;  %v716_v38 = vpack.c.bf16 %v124_v34, %v123_v33  ;;  %v125_v39 = vld [vmem:[#allocation7 + $0x70] sm:$0xff]  ;;  %v220_v42 = vld [vmem:[#allocation8 + $0x60] sm:$0xff] }
  0x63   :  { %v126_v40 = vld [vmem:[#allocation7 + $0x78] sm:$0xff]  ;;  %v744_v41 = vpack.c.bf16 %v219_v37, %v218_v36  ;;  %v221_v43 = vld [vmem:[#allocation8 + $0x68] sm:$0xff]  ;;  %v222_v47 = vld [vmem:[#allocation8 + $0x70] sm:$0xff] }
  0x64   :  { %v720_v44 = vpack.c.bf16 %v126_v40, %v125_v39  ;;  %v748_v45 = vpack.c.bf16 %v221_v43, %v220_v42  ;;  %v110_v46 = vld [vmem:[#allocation2 + $0x8] sm:$0xff]  ;;  %v223_v48 = vld [vmem:[#allocation8 + $0x78] sm:$0xff]  ;;  %v528_v50 = vld [vmem:[%s1147_s3] ss:$0 sm:$0xff] }
  0x65   :  { %703 = vmatpush3.bf16.msra.mxu0 %v700_v8  ;;  %731 = vmatpush3.bf16.msra.mxu1 %v728_v17  ;;  %v752_v49 = vpack.c.bf16 %v223_v48, %v222_v47  ;;  %v359_v55 = vld [vmem:[#allocation10] sm:$0xff]  ;;  %v360_v56 = vld [vmem:[#allocation10 + $0x8] sm:$0xff]  ;;  %v361_v58 = vld [vmem:[#allocation10 + $0x10] sm:$0xff] }
  0x66   :  { %705 = vmatprep.subr.bf16.mxu0 %v704_v20  ;;  %733 = vmatprep.subr.bf16.mxu1 %v732_v23  ;;  %v756_v57 = vpack.c.bf16 %v360_v56, %v359_v55  ;;  %v362_v59 = vld [vmem:[#allocation10 + $0x18] sm:$0xff]  ;;  %v363_v61 = vld [vmem:[#allocation10 + $0x20] sm:$0xff]  ;;  %v364_v62 = vld [vmem:[#allocation10 + $0x28] sm:$0xff] }
  0x67   :  { %v760_v60 = vpack.c.bf16 %v362_v59, %v361_v58  ;;  %v764_v63 = vpack.c.bf16 %v364_v62, %v363_v61  ;;  %v365_v0 = vld [vmem:[#allocation10 + $0x30] sm:$0xff]  ;;  %v366_v1 = vld [vmem:[#allocation10 + $0x38] sm:$0xff]  ;;  %v367_v3 = vld [vmem:[#allocation10 + $0x40] sm:$0xff]  ;;  %v956_v61 = vmov -1.0  }
  0x68   :  { %v768_v2 = vpack.c.bf16 %v366_v1, %v365_v0  ;;  %v368_v4 = vld [vmem:[#allocation10 + $0x48] sm:$0xff]  ;;  %v369_v6 = vld [vmem:[#allocation10 + $0x50] sm:$0xff]  ;;  %v370_v7 = vld [vmem:[#allocation10 + $0x58] sm:$0xff] }
  0x69   :  { %707 = vmatpush3.bf16.msra.mxu0 %v704_v20  ;;  %735 = vmatpush3.bf16.msra.mxu1 %v732_v23  ;;  %v772_v5 = vpack.c.bf16 %v368_v4, %v367_v3  ;;  %v776_v8 = vpack.c.bf16 %v370_v7, %v369_v6  ;;  %v371_v9 = vld [vmem:[#allocation10 + $0x60] sm:$0xff]  ;;  %v372_v10 = vld [vmem:[#allocation10 + $0x68] sm:$0xff]  ;;  %v373_v12 = vld [vmem:[#allocation10 + $0x70] sm:$0xff] }
  0x6a   :  { %709 = vmatprep.subr.bf16.mxu0 %v708_v26  ;;  %737 = vmatprep.subr.bf16.mxu1 %v736_v29  ;;  %v780_v11 = vpack.c.bf16 %v372_v10, %v371_v9  ;;  %v374_v13 = vld [vmem:[#allocation10 + $0x78] sm:$0xff]  ;;  %v529_v15 = vld [vmem:[%s1149_s5] ss:$0 sm:$0xff]  ;;  %v462_v9 = vlaneseq }
  0x6b   :  { %v784_v14 = vpack.c.bf16 %v374_v13, %v373_v12  ;;  %v530_v10 = vld [vmem:[%s1151_s7] ss:$0 sm:$0xff] }
  0x6d   :  { %711 = vmatpush3.bf16.msra.mxu0 %v708_v26  ;;  %739 = vmatpush3.bf16.msra.mxu1 %v736_v29 }
  0x6e   :  { %713 = vmatprep.subr.bf16.mxu0 %v712_v32  ;;  %741 = vmatprep.subr.bf16.mxu1 %v740_v35 }
  0x71   :  { %715 = vmatpush3.bf16.msra.mxu0 %v712_v32  ;;  %743 = vmatpush3.bf16.msra.mxu1 %v740_v35 }
  0x72   :  { %717 = vmatprep.subr.bf16.mxu0 %v716_v38  ;;  %745 = vmatprep.subr.bf16.mxu1 %v744_v41 }
  0x75   :  { %719 = vmatpush3.bf16.msra.mxu0 %v716_v38  ;;  %747 = vmatpush3.bf16.msra.mxu1 %v744_v41 }
  0x76   :  { %721 = vmatprep.subr.bf16.mxu0 %v720_v44  ;;  %749 = vmatprep.subr.bf16.mxu1 %v748_v45 }
  0x79   :  { %723 = vmatpush3.bf16.msra.mxu0 %v720_v44  ;;  %751 = vmatpush3.bf16.msra.mxu1 %v748_v45 }
  0x7a   :  { %753 = vmatprep.subr.bf16.mxu1 %v752_v49  ;;  %757 = vmatprep.subr.bf16.mxu0 %v756_v57 }
  0x7c   :  { %620 = vmatmul.mubr.f32.vlgmr.msra.gmra.mrb[0].mxu0 %v110_v46 }
  0x7d   :  { %755 = vmatpush3.bf16.msra.mxu1 %v752_v49  ;;  %759 = vmatpush3.bf16.msra.mxu0 %v756_v57 }
  0x7e   :  { %761 = vmatprep.subr.bf16.mxu0 %v760_v60 }
  0x81   :  { %763 = vmatpush3.bf16.msra.mxu0 %v760_v60 }
  0x82   :  { %765 = vmatprep.subr.bf16.mxu0 %v764_v63 }
  0x85   :  { %767 = vmatpush3.bf16.msra.mxu0 %v764_v63 }
  0x86   :  { %769 = vmatprep.subr.bf16.mxu0 %v768_v2 }
  0x89   :  { %771 = vmatpush3.bf16.msra.mxu0 %v768_v2 }
  0x8a   :  { %773 = vmatprep.subr.bf16.mxu0 %v772_v5 }
  0x8d   :  { %775 = vmatpush3.bf16.msra.mxu0 %v772_v5 }
  0x8e   :  { %777 = vmatprep.subr.bf16.mxu0 %v776_v8 }
  0x91   :  { %779 = vmatpush3.bf16.msra.mxu0 %v776_v8 }
  0x92   :  { %781 = vmatprep.subr.bf16.mxu0 %v780_v11 }
  0x95   :  { %783 = vmatpush3.bf16.msra.mxu0 %v780_v11 }
  0x96   :  { %785 = vmatprep.subr.bf16.mxu0 %v784_v14 }
  0x99   :  { %787 = vmatpush3.bf16.msra.mxu0 %v784_v14  ;;  %v463_v14 = vand.u32 127, %v462_v9 }
  0x9b   :  { %vm464_vm2 = vcmp.lt.s32.totalorder %v463_v14, 32 }
 0x14f   :  { %v621_v51 = vpop.f32.mrb[0].mxu0 }
 0x150   :  { %v199_v52 = vpop.f32.mrb[1].mxu0  ;;  %v1107_v54 = vadd.f32 %v621_v51, %v528_v50 }
 0x151   :  { %v1105_v53 = vadd.f32 %v528_v50, %v199_v52 }
 0x153   :  { %654 = vmatprep.mubr.f32.mxu1 %v1105_v53 }
 0x154   :  { %655 = vmatmul.mubr.f32.vlgmr.msra.gmra.mrb[0].mxu1 %v1107_v54 }
 0x227   :  { %v656_v16 = vpop.f32.mrb[0].mxu1 }
 0x228   :  { %v302_v17 = vadd.f32 %v656_v16, %v529_v15  ;;  %v296_v18 = vpop.f32.mrb[1].mxu1  ;;  %v458_v16 = vld [vmem:[#allocation5] sm:$0xff] }
 0x229   :  { %v297_v19 = vadd.f32 %v529_v15, %v296_v18 }
 0x22a   :  { %v308_v20 = vmul.f32 0.70710677, %v302_v17  ;;  %v306_v6 = vmul.f32 0.5, %v302_v17  ;;  %v459_v17 = vld [vmem:[#allocation5 + $0x8] sm:$0xff] }
 0x22b   :  { %v307_v21 = vmul.f32 0.70710677, %v297_v19  ;;  %v305_v4 = vmul.f32 0.5, %v297_v19 }
 0x22c   :  { %v314_v22 = vand.u32 2147483647, %v308_v20  ;;  %vm310_vm0 = vcmp.ge.f32.partialorder %v308_v20, 0.0 }
 0x22d   :  { %v313_v23 = vand.u32 2147483647, %v307_v21  ;;  %vm309_vm1 = vcmp.ge.f32.partialorder %v307_v21, 0.0  ;;  %v312_v62 = vsel %vm310_vm0, 1.0, %v956_v61 }
 0x22e   :  { %v316_v24 = vmul.f32 0.3275911, %v314_v22  ;;  %v342_v28 = vsub.f32 0.0, %v314_v22  ;;  %v311_v1 = vsel %vm309_vm1, 1.0, %v956_v61 }
 0x22f   :  { %v315_v25 = vmul.f32 0.3275911, %v313_v23  ;;  %v341_v29 = vsub.f32 0.0, %v313_v23 }
 0x230   :  { %v318_v26 = vadd.f32 1.0, %v316_v24  ;;  %v344_v31 = vmul.f32 %v342_v28, %v314_v22 }
 0x231   :  { %v317_v27 = vadd.f32 1.0, %v315_v25  ;;  %v343_v34 = vmul.f32 %v341_v29, %v313_v23 }
 0x232   :  { %797 = vrcp.f32 %v318_v26  ;;  %v347_v37 = vmul.f32 1.442695, %v344_v31 }
 0x233   :  { %799 = vrcp.f32 %v317_v27  ;;  %v345_v40 = vmul.f32 1.442695, %v343_v34 }
 0x234   :  { %801 = vpow2.f32 %v347_v37 }
 0x235   :  { %803 = vpow2.f32 %v345_v40 }
 0x23c   :  { %v798_v30 = vpop.eup %797 }
 0x23d   :  { %v800_v32 = vpop.eup %799  ;;  %v324_v33 = vmul.f32 1.0614054, %v798_v30 }
 0x23e   :  { %v323_v35 = vmul.f32 1.0614054, %v800_v32  ;;  %v802_v55 = vpop.eup %801 }
 0x23f   :  { %v326_v36 = vadd.f32 -1.4531521, %v324_v33  ;;  %v804_v57 = vpop.eup %803 }
 0x240   :  { %v325_v38 = vadd.f32 -1.4531521, %v323_v35 }
 0x241   :  { %v328_v39 = vmul.f32 %v798_v30, %v326_v36 }
 0x242   :  { %v327_v41 = vmul.f32 %v800_v32, %v325_v38 }
 0x243   :  { %v330_v42 = vadd.f32 1.4214138, %v328_v39  ;;  %v531_v39 = vld [vmem:[%s1152_s8] ss:$0 sm:$0xff] }
 0x244   :  { %v329_v43 = vadd.f32 1.4214138, %v327_v41  ;;  %v532_v41 = vld [vmem:[%s1153_s9] ss:$0 sm:$0xff] }
 0x245   :  { %v332_v44 = vmul.f32 %v798_v30, %v330_v42 }
 0x246   :  { %v331_v45 = vmul.f32 %v800_v32, %v329_v43 }
 0x247   :  { %v334_v46 = vadd.f32 -0.28449672, %v332_v44 }
 0x248   :  { %v333_v47 = vadd.f32 -0.28449672, %v331_v45 }
 0x249   :  { %v336_v48 = vmul.f32 %v798_v30, %v334_v46 }
 0x24a   :  { %v335_v49 = vmul.f32 %v800_v32, %v333_v47 }
 0x24b   :  { %v338_v50 = vadd.f32 0.2548296, %v336_v48 }
 0x24c   :  { %v337_v51 = vadd.f32 0.2548296, %v335_v49 }
 0x24d   :  { %v340_v52 = vmul.f32 %v798_v30, %v338_v50 }
 0x24e   :  { %v339_v56 = vmul.f32 %v800_v32, %v337_v51 }
 0x24f   :  { %v350_v58 = vmul.f32 %v802_v55, %v340_v52 }
 0x250   :  { %v349_v59 = vmul.f32 %v804_v57, %v339_v56 }
 0x251   :  { %v352_v60 = vsub.f32 1.0, %v350_v58 }
 0x252   :  { %v351_v63 = vsub.f32 1.0, %v349_v59 }
 0x253   :  { %v354_v0 = vmul.f32 %v352_v60, %v312_v62 }
 0x254   :  { %v353_v2 = vmul.f32 %v351_v63, %v311_v1 }
 0x255   :  { %v356_v3 = vadd.f32 1.0, %v354_v0 }
 0x256   :  { %v355_v5 = vadd.f32 1.0, %v353_v2 }
 0x257   :  { %v358_v8 = vmul.f32 %v356_v3, %v306_v6 }
 0x258   :  { %v357_v7 = vmul.f32 %v355_v5, %v305_v4 }
 0x25a   :  { %689 = vmatprep.mubr.f32.mxu0 %v357_v7 }
 0x25b   :  { %690 = vmatmul.mubr.f32.vlgmr.msra.gmra.mrb[2].mxu0 %v358_v8 }
 0x32e   :  { %v691_v11 = vpop.f32.mrb[2].mxu0 }
 0x32f   :  { %v453_v12 = vadd.f32 %v691_v11, %v530_v10  ;;  %v447_v13 = vpop.f32.mrb[3].mxu0 }
 0x330   :  { %v448_v15 = vadd.f32 %v530_v10, %v447_v13 }
 0x331   :  { %v457_v18 = vadd.f32 %v453_v12, %v1107_v54 }
 0x332   :  { %v456_v19 = vadd.f32 %v448_v15, %v1105_v53 }
 0x333   :  { %v461_v22 = vadd.f32 %v459_v17, %v457_v18 }
 0x334   :  { %v460_v20 = vadd.f32 %v458_v16, %v456_v19 }
 0x335   :  { %v466_v23 = vsel %vm464_vm2, %v461_v22, 0.0 }
 0x336   :  { %v465_v21 = vsel %vm464_vm2, %v460_v20, 0.0 }
 0x337   :  { %467 = vadd.xlane.f32.xlu0 %v465_v21 }
 0x33b   :  { %469 = vadd.xlane.f32.xlu0 %v466_v23 }
 0x3c4   :  { %v468_v24 = vpop.xlane.xlu0 %467 }
 0x3c5   :  { %v471_v25 = vmul.f32 0.03125, %v468_v24 }
 0x3c7   :  { %v473_v26 = vsub.f32 %v465_v21, %v471_v25 }
 0x3c8   :  { %v470_v27 = vpop.xlane.xlu0 %469 }
 0x3c9   :  { %v472_v28 = vmul.f32 0.03125, %v470_v27  ;;  %v475_v29 = vsel %vm464_vm2, %v473_v26, 0.0 }
 0x3ca   :  { %v477_v54 = vmul.f32 %v475_v29, %v475_v29 }
 0x3cb   :  { %v474_v30 = vsub.f32 %v466_v23, %v472_v28 }
 0x3cc   :  { %479 = vadd.xlane.f32.xlu1 %v477_v54 }
 0x3cd   :  { %v476_v53 = vsel %vm464_vm2, %v474_v30, 0.0 }
 0x3ce   :  { %v478_v31 = vmul.f32 %v476_v53, %v476_v53 }
 0x3d0   :  { %481 = vadd.xlane.f32.xlu1 %v478_v31 }
 0x459   :  { %v480_v32 = vpop.xlane.xlu1 %479 }
 0x45a   :  { %v483_v33 = vmul.f32 0.03125, %v480_v32 }
 0x45c   :  { %v485_v34 = vadd.f32 1e-12, %v483_v33 }
 0x45d   :  { %v482_v35 = vpop.xlane.xlu1 %481 }
 0x45e   :  { %805 = vrsqrt.f32 %v485_v34  ;;  %v484_v36 = vmul.f32 0.03125, %v482_v35 }
 0x460   :  { %v486_v37 = vadd.f32 1e-12, %v484_v36 }
 0x462   :  { %807 = vrsqrt.f32 %v486_v37 }
 0x468   :  { %v806_v38 = vpop.eup %805 }
 0x469   :  { %v489_v40 = vmul.f32 %v806_v38, %v475_v29 }
 0x46b   :  { %v497_v42 = vmul.f32 %v531_v39, %v489_v40 }
 0x46c   :  { %v808_v43 = vpop.eup %807 }
 0x46d   :  { %v490_v44 = vmul.f32 %v808_v43, %v476_v53  ;;  %v505_v45 = vadd.f32 %v532_v41, %v497_v42 }
 0x46f   :  { %v498_v46 = vmul.f32 %v531_v39, %v490_v44  ;;  %507 = vst [vmem:[#allocation11] sm:$0xff] %v505_v45 }
 0x471   :  { %v506_v47 = vadd.f32 %v532_v41, %v498_v46 }
 0x473   :  { %508 = vst [vmem:[#allocation11 + $0x8] sm:$0xff] %v506_v47 }
 0x474   :  { %930 = shalt.err (!%p927_p2)
}
 0x475   :  { %s931_s20 = scalar_lea.hbm %s1154_s10, 256 }
 0x476   :  { %p932_p3 = scmp.ne.s32.totalorder %s1154_s10, %s931_s20  ;;  %p935_p4 = scmp.lt.u32.totalorder %s931_s20, %s1154_s10 }
 0x478   :  { %p937_p5 = pnand %p935_p4, %p932_p3 }
 0x47a   :  { %940 = shalt.err (!%p937_p5)
}
 0x47b   :  { %520 = dma.vmem_to_hbm [thread:$0]  %s515_s21, 256, %s1154_s10, [#allocation4], %s951_s25, %s951_s25, %s952_s26  }
 0x47c   :  { %947 = dma.done.wait [#allocation4], 256  }
 0x47d   :  { %948 = vsyncadd [#allocation4], 4294967040 }
 0x47e   :  { %524 = vsyncpa [#allocation3], 1 }
 0x47f   :  { %525 = vsyncpa [#allocation6], 1 }
 0x480   :  { %526 = vsyncpa [#allocation9], 1 }
 0x481   :  { %527 = vsyncpa [#allocation4], 1 }

</bundles_post_ra>
